<compile_context>
chip_gen: v6e
topology: v6e:2x2x1
jax: 0.10.0
libtpu: 0.0.40
codegen_flags: <defaults>
</compile_context>

<pallas_src>
import functools
import math

import jax
import jax.numpy as jnp
import numpy as np
from jax.experimental import pallas as pl
from jax.experimental.pallas import tpu as pltpu


# ----------------------------- Pallas kernel --------------------------------

def _encode_compressor_kernel(B, D, Cpad, T_out,
                              x_ref,     # (1, B*(3*d_in+1), T)   im2col history + ones rows
                              w3_ref,    # (1, B*D, B*(3*d_in+1)) block-diag conv3 weight (+bias col)
                              add_ref,   # (1, B*D, T)            joint_emb + time enc (post-ReLU add)
                              w15_ref,   # (T, T_out*Cpad)        block-diag conv15 weight (zero-padded)
                              wpl_ref,   # (1, Cpad+8, Cpad)      post_linear W^T (padded); row Cpad = bias
                              out_ref):  # (B, 1, D, Cpad)
    # Conv1d(d_in->D, k=3, pad=1) for all B batches in one matmul; bias folded in
    # via the ones row of x / extra column of the block-diagonal weight.
    y = jnp.dot(w3_ref[0], x_ref[0], preferred_element_type=jnp.float32)    # (B*D, T)
    ctx = jnp.maximum(y, 0.0) + add_ref[0]                                   # (B*D, T)

    # FlexConv1d(1->C, k=15, stride=15): one matmul against the block-diagonal
    # weight, then max over the T_out 128-lane-aligned column groups (pure VPU).
    z = jnp.dot(ctx, w15_ref[...], preferred_element_type=jnp.float32)       # (B*D, T_out*Cpad)
    feat = z[:, :Cpad]
    for t0 in range(1, T_out):                                               # tiny, unrolled
        feat = jnp.maximum(feat, z[:, t0 * Cpad:(t0 + 1) * Cpad])            # (B*D, Cpad)

    # Per-joint post_linear; conv15 bias + post_linear bias are folded into row Cpad.
    wpl = wpl_ref[0]                                                         # (Cpad+8, Cpad)
    out = jnp.dot(feat, wpl[:Cpad], preferred_element_type=jnp.float32)
    out = out + wpl[Cpad:Cpad + 1]                                           # (B*D, Cpad)

    for b in range(B):                                                       # aligned, lane-dense stores
        out_ref[b, 0] = out[b * D:(b + 1) * D].astype(out_ref.dtype)


# ------------------------------ param packing --------------------------------

def pack_params(params, B, T):
    """One-time packing of module parameters into kernel-friendly operands.
    Call OUTSIDE the jitted per-call function (params are static per model)."""
    N, D = params["joint_emb"].shape
    d_in = params["conv3_w"].shape[2]
    C = params["conv15_w"].shape[0]
    Cpad = ((C + 127) // 128) * 128
    K = 15
    T_out = (T - K) // K + 1
    K3 = 3 * d_in
    f32 = jnp.float32

    # conv3: augmented (weight | bias) per joint, block-diagonal over batch so the
    # whole batch is one (B*D, B*(K3+1)) @ (B*(K3+1), T) matmul.
    w3r = jnp.transpose(params["conv3_w"], (0, 1, 3, 2)).reshape(N, D, K3)   # rows k*d_in + f
    w3aug = jnp.concatenate([w3r, params["conv3_b"][:, :, None]], axis=2)    # (N, D, K3+1)
    w3bd = jnp.einsum("xy,ndk->nxdyk", jnp.eye(B, dtype=f32), w3aug)
    w3bd = w3bd.reshape(N, B * D, B * (K3 + 1))

    # post-ReLU additive term: joint_embedding + positional time encoding, tiled over B.
    time_dt = jnp.transpose(params["time_enc"][0, :T, 0, :], (1, 0)).astype(f32)   # (D, T)
    add = params["joint_emb"][:, :, None] + time_dt[None]                    # (N, D, T)
    add = jnp.broadcast_to(add[:, None], (N, B, D, T)).reshape(N, B * D, T)

    # conv15: block-diagonal (T, T_out*Cpad) weight; window t0 lives at 128-aligned lanes.
    w15 = params["conv15_w"][:, 0, :]                                        # (C, K)
    w15bd = jnp.zeros((T, T_out * Cpad), f32)
    for t0 in range(T_out):
        w15bd = w15bd.at[t0 * K:(t0 + 1) * K, t0 * Cpad:t0 * Cpad + C].set(w15.T)

    # post_linear: W^T padded to (Cpad, Cpad); conv15 bias folded through it into
    # the output bias  (max(x)+b15 == max(x+b15);  (f+b15)@W^T+b == f@W^T + (b15@W^T+b)).
    b_eff = params["pl_b"] + jnp.einsum("c,nec->ne", params["conv15_b"], params["pl_w"])
    wpl = jnp.zeros((N, Cpad + 8, Cpad), f32)
    wpl = wpl.at[:, :C, :C].set(jnp.transpose(params["pl_w"], (0, 2, 1)))
    wpl = wpl.at[:, Cpad, :C].set(b_eff)

    return dict(w3bd=w3bd, add=add, w15bd=w15bd, wpl=wpl)


# ------------------------------ wrapper --------------------------------------

def encode_compressor_pallas(history, packed):
    """history: (B, T, N, d_in), packed = pack_params(...)  ->  (B, N, D, C)."""
    B, T, N, d_in = history.shape
    BD = packed["w3bd"].shape[1]
    D = BD // B
    C = D * (D - 1) // 2
    Cpad = packed["wpl"].shape[2]
    T_out = packed["w15bd"].shape[1] // Cpad
    K3 = 3 * d_in
    R = K3 + 1

    # im2col over time (pad=1, taps k=0..2) + ones row per batch for the bias fold.
    # Tiny per-call XLA op; all weight packing happens once in pack_params().
    xpad = jnp.pad(history.astype(jnp.float32), ((0, 0), (1, 1), (0, 0), (0, 0)))
    cols = jnp.stack([xpad[:, k:k + T] for k in range(3)], axis=2)           # (B, T, 3, N, d_in)
    xi = jnp.transpose(cols, (3, 0, 2, 4, 1)).reshape(N, B, K3, T)           # (N, B, 3*d_in, T)
    xi = jnp.concatenate([xi, jnp.ones((N, B, 1, T), jnp.float32)], axis=2)
    xi = xi.reshape(N, B * R, T)

    kernel = functools.partial(_encode_compressor_kernel, B, D, Cpad, T_out)

    out = pl.pallas_call(
        kernel,
        out_shape=jax.ShapeDtypeStruct((B, N, D, Cpad), jnp.float32),
        grid_spec=pltpu.PrefetchScalarGridSpec(
            num_scalar_prefetch=0,
            grid=(N,),
            in_specs=[
                pl.BlockSpec((1, B * R, T), lambda n: (n, 0, 0)),
                pl.BlockSpec((1, B * D, B * R), lambda n: (n, 0, 0)),
                pl.BlockSpec((1, B * D, T), lambda n: (n, 0, 0)),
                pl.BlockSpec((T, T_out * Cpad), lambda n: (0, 0)),       # shared, VMEM-resident
                pl.BlockSpec((1, Cpad + 8, Cpad), lambda n: (n, 0, 0)),
            ],
            out_specs=pl.BlockSpec((B, 1, D, Cpad), lambda n: (0, n, 0, 0)),
        ),
        compiler_params=pltpu.CompilerParams(
            dimension_semantics=("parallel",)),
    )(xi, packed["w3bd"], packed["add"], packed["w15bd"], packed["wpl"])

    return out[..., :C]


# ------------------------- parameters / pos encoding -------------------------

def get_angles(pos, i, d_model):
    angle_rates = 1 / np.power(10000, 2 * (i // 2) / np.float32(d_model))
    return pos * angle_rates


def positional_encoding(window_len, d_model):
    angle_rads = get_angles(np.arange(window_len)[:, np.newaxis],
                            np.arange(d_model)[np.newaxis, :], d_model)
    angle_rads[:, 0::2] = np.sin(angle_rads[:, 0::2])
    angle_rads[:, 1::2] = np.cos(angle_rads[:, 1::2])
    return angle_rads[np.newaxis, :, np.newaxis, :]     # (1, W, 1, D)


def init_params(key, D_decoder, joint_num, d_in, window_len):
    D = D_decoder
    C = D * (D - 1) // 2
    ks = jax.random.split(key, 7)

    def u(k, shape, bound):
        return jax.random.uniform(k, shape, jnp.float32, -bound, bound)

    b3 = 1.0 / math.sqrt(d_in * 3)
    b15 = 1.0 / math.sqrt(1 * 15)
    bl = 1.0 / math.sqrt(C)
    return dict(
        conv3_w=u(ks[0], (joint_num, D, d_in, 3), b3),     # per-joint Conv1d(d_in, D, 3)
        conv3_b=u(ks[1], (joint_num, D), b3),
        joint_emb=jax.random.normal(ks[2], (joint_num, D), jnp.float32),
        conv15_w=u(ks[3], (C, 1, 15), b15),                # FlexConv1d(1, C, 15, stride 15)
        conv15_b=u(ks[4], (C,), b15),
        pl_w=u(ks[5], (joint_num, C, C), bl),              # per-joint Linear(C, C)
        pl_b=u(ks[6], (joint_num, C), bl),
        time_enc=jnp.asarray(positional_encoding(window_len, D), jnp.float32),
    )


# ------------------------------ pure-JAX reference ---------------------------

def encode_compressor_ref(history, params):
    B, T, N, d = history.shape
    D = params["joint_emb"].shape[1]
    K = 15
    # HistoryEncoder: per-joint Conv1d(d, D, 3, pad=1) over time
    xp = jnp.pad(history, ((0, 0), (1, 1), (0, 0), (0, 0)))
    conv = jnp.zeros((B, T, N, D), jnp.float32)
    for k in range(3):
        conv = conv + jnp.einsum("btnd,nfd->btnf", xp[:, k:k + T],
                                 params["conv3_w"][..., k])
    conv = conv + params["conv3_b"][None, None]
    ctx = jnp.maximum(conv, 0.0)
    ctx = ctx + params["joint_emb"][None, None]
    # (spatial attention output is discarded in the torch forward)
    ctx = ctx + params["time_enc"][:, :T]                      # (1, T, 1, D)
    # EncodeCompressor: stride-15 conv + max + per-joint Linear
    T_out = (T - K) // K + 1
    w15 = params["conv15_w"][:, 0, :]                          # (C, K)
    cn = jnp.transpose(ctx, (0, 2, 3, 1))                      # (B, N, D, T)
    conv2 = jnp.stack(
        [jnp.einsum("bndk,ck->bndc", cn[..., t0 * K:(t0 + 1) * K], w15)
         for t0 in range(T_out)], axis=-1)                     # (B, N, D, C, T_out)
    conv2 = conv2 + params["conv15_b"][None, None, None, :, None]
    feat = jnp.max(conv2, axis=-1)                             # (B, N, D, C)
    out = jnp.einsum("bndc,nec->bnde", feat, params["pl_w"]) + params["pl_b"][None, :, None, :]
    return out


# ----------------------------------- main ------------------------------------

if __name__ == "__main__":
    key = jax.random.PRNGKey(0)
    B = 2
    D_decoder = 16            # -> C = 120 (padded to 128 inside the kernel)
    joint_num = 4
    d_in = 8
    window_len = 30           # T (>= 15) -> T_out = 2
    # num_head_spacial / dropout_rate only affect the discarded attention branch.

    kx, kp = jax.random.split(key)
    history = jax.random.normal(kx, (B, window_len, joint_num, d_in), jnp.float32)
    params = init_params(kp, D_decoder, joint_num, d_in, window_len)

    packed = pack_params(params, B=B, T=window_len)     # once, outside the per-call jit
    run = jax.jit(encode_compressor_pallas)
    out = jax.block_until_ready(run(history, packed))

    ref = jax.block_until_ready(encode_compressor_ref(history, params))
    np.testing.assert_allclose(np.asarray(out), np.asarray(ref), rtol=1e-2, atol=1e-2)
    assert out.shape == (B, joint_num, D_decoder, D_decoder * (D_decoder - 1) // 2)

    print("KERNEL_OK")
</pallas_src>

<mosaic_0001>
module attributes {stable_mosaic.version = 11 : i64} {
  func.func @_encode_compressor_kernel(%arg0: i32, %arg1: memref<1x50x30xf32, #tpu.memory_space<vmem>>, %arg2: memref<1x32x50xf32, #tpu.memory_space<vmem>>, %arg3: memref<1x32x30xf32, #tpu.memory_space<vmem>>, %arg4: memref<30x256xf32, #tpu.memory_space<vmem>>, %arg5: memref<1x136x128xf32, #tpu.memory_space<vmem>>, %arg6: memref<2x1x16x128xf32, #tpu.memory_space<vmem>>) attributes {dimension_semantics = [#tpu.dimension_semantics<parallel>], iteration_bounds = array<i64: 4>, scalar_prefetch = 0 : i64, scratch_operands = 0 : i64, tpu.core_type = #tpu.core_type<tc>, window_params = [{transform_indices = @transform_0, window_bounds = array<i64: 1, 50, 30>}, {transform_indices = @transform_1, window_bounds = array<i64: 1, 32, 50>}, {transform_indices = @transform_2, window_bounds = array<i64: 1, 32, 30>}, {pipeline_mode = #tpu.pipeline_mode<synchronous>, transform_indices = @transform_3, window_bounds = array<i64: 30, 256>}, {transform_indices = @transform_4, window_bounds = array<i64: 1, 136, 128>}, {transform_indices = @transform_5, window_bounds = array<i64: 2, 1, 16, 128>}]} {
    %c0 = arith.constant 0 : index
    %c0_0 = arith.constant 0 : index
    %c0_1 = arith.constant 0 : index
    %0 = vector.load %arg2[%c0, %c0_0, %c0_1] : memref<1x32x50xf32, #tpu.memory_space<vmem>>, vector<1x32x50xf32>
    %1 = vector.shape_cast %0 : vector<1x32x50xf32> to vector<32x50xf32>
    %c0_2 = arith.constant 0 : index
    %c0_3 = arith.constant 0 : index
    %c0_4 = arith.constant 0 : index
    %2 = vector.load %arg1[%c0_2, %c0_3, %c0_4] : memref<1x50x30xf32, #tpu.memory_space<vmem>>, vector<1x50x30xf32>
    %3 = vector.shape_cast %2 : vector<1x50x30xf32> to vector<50x30xf32>
    %cst = arith.constant dense<0.000000e+00> : vector<32x30xf32>
    %4 = tpu.matmul %1, %3, %cst {dimension_numbers = #tpu.dot_dimension_numbers<[1], [0], [0], [1], [0, 0, 1, 1], [], []>} : vector<32x50xf32>, vector<50x30xf32>, vector<32x30xf32> -> vector<32x30xf32>
    %cst_5 = arith.constant 0.000000e+00 : f32
    %5 = vector.broadcast %cst_5 : f32 to vector<32x30xf32>
    %6 = arith.maximumf %4, %5 : vector<32x30xf32>
    %c0_6 = arith.constant 0 : index
    %c0_7 = arith.constant 0 : index
    %c0_8 = arith.constant 0 : index
    %7 = vector.load %arg3[%c0_6, %c0_7, %c0_8] : memref<1x32x30xf32, #tpu.memory_space<vmem>>, vector<1x32x30xf32>
    %8 = vector.shape_cast %7 : vector<1x32x30xf32> to vector<32x30xf32>
    %9 = arith.addf %6, %8 : vector<32x30xf32>
    %c0_9 = arith.constant 0 : index
    %c0_10 = arith.constant 0 : index
    %10 = vector.load %arg4[%c0_9, %c0_10] : memref<30x256xf32, #tpu.memory_space<vmem>>, vector<30x256xf32>
    %cst_11 = arith.constant dense<0.000000e+00> : vector<32x256xf32>
    %11 = tpu.matmul %9, %10, %cst_11 {dimension_numbers = #tpu.dot_dimension_numbers<[1], [0], [0], [1], [0, 0, 1, 1], [], []>} : vector<32x30xf32>, vector<30x256xf32>, vector<32x256xf32> -> vector<32x256xf32>
    %12 = vector.extract_strided_slice %11 {offsets = [0, 0], sizes = [32, 128], strides = [1, 1]} : vector<32x256xf32> to vector<32x128xf32>
    %13 = vector.extract_strided_slice %11 {offsets = [0, 128], sizes = [32, 128], strides = [1, 1]} : vector<32x256xf32> to vector<32x128xf32>
    %14 = arith.maximumf %12, %13 : vector<32x128xf32>
    %c0_12 = arith.constant 0 : index
    %c0_13 = arith.constant 0 : index
    %c0_14 = arith.constant 0 : index
    %15 = vector.load %arg5[%c0_12, %c0_13, %c0_14] : memref<1x136x128xf32, #tpu.memory_space<vmem>>, vector<1x136x128xf32>
    %16 = vector.shape_cast %15 : vector<1x136x128xf32> to vector<136x128xf32>
    %17 = vector.extract_strided_slice %16 {offsets = [0, 0], sizes = [128, 128], strides = [1, 1]} : vector<136x128xf32> to vector<128x128xf32>
    %cst_15 = arith.constant dense<0.000000e+00> : vector<32x128xf32>
    %18 = tpu.matmul %14, %17, %cst_15 {dimension_numbers = #tpu.dot_dimension_numbers<[1], [0], [0], [1], [0, 0, 1, 1], [], []>} : vector<32x128xf32>, vector<128x128xf32>, vector<32x128xf32> -> vector<32x128xf32>
    %19 = vector.extract_strided_slice %16 {offsets = [128, 0], sizes = [1, 128], strides = [1, 1]} : vector<136x128xf32> to vector<1x128xf32>
    %20 = vector.broadcast %19 : vector<1x128xf32> to vector<32x128xf32>
    %21 = arith.addf %18, %20 : vector<32x128xf32>
    %22 = vector.extract_strided_slice %21 {offsets = [0, 0], sizes = [16, 128], strides = [1, 1]} : vector<32x128xf32> to vector<16x128xf32>
    %c0_16 = arith.constant 0 : index
    %c0_17 = arith.constant 0 : index
    %c0_18 = arith.constant 0 : index
    %c0_19 = arith.constant 0 : index
    %23 = vector.load %arg6[%c0_16, %c0_17, %c0_18, %c0_19] : memref<2x1x16x128xf32, #tpu.memory_space<vmem>>, vector<1x1x16x128xf32>
    %24 = vector.shape_cast %23 : vector<1x1x16x128xf32> to vector<16x128xf32>
    %25 = vector.shape_cast %22 : vector<16x128xf32> to vector<1x1x16x128xf32>
    tpu.vector_store %arg6[%c0_16, %c0_17, %c0_18, %c0_19], %25 {strides = array<i32>} : memref<2x1x16x128xf32, #tpu.memory_space<vmem>>, vector<1x1x16x128xf32>,
    %26 = vector.extract_strided_slice %21 {offsets = [16, 0], sizes = [16, 128], strides = [1, 1]} : vector<32x128xf32> to vector<16x128xf32>
    %c1 = arith.constant 1 : index
    %c0_20 = arith.constant 0 : index
    %c0_21 = arith.constant 0 : index
    %c0_22 = arith.constant 0 : index
    %27 = vector.load %arg6[%c1, %c0_20, %c0_21, %c0_22] : memref<2x1x16x128xf32, #tpu.memory_space<vmem>>, vector<1x1x16x128xf32>
    %28 = vector.shape_cast %27 : vector<1x1x16x128xf32> to vector<16x128xf32>
    %29 = vector.shape_cast %26 : vector<16x128xf32> to vector<1x1x16x128xf32>
    tpu.vector_store %arg6[%c1, %c0_20, %c0_21, %c0_22], %29 {strides = array<i32>} : memref<2x1x16x128xf32, #tpu.memory_space<vmem>>, vector<1x1x16x128xf32>,
    return
  }
  func.func @transform_0(%arg0: i32) -> (i32, i32, i32) {
    %c0_i32 = arith.constant 0 : i32
    %c0_i32_0 = arith.constant 0 : i32
    %c0_i32_1 = arith.constant 0 : i32
    return %arg0, %c0_i32, %c0_i32_0 : i32, i32, i32
  }
  func.func @transform_1(%arg0: i32) -> (i32, i32, i32) {
    %c0_i32 = arith.constant 0 : i32
    %c0_i32_0 = arith.constant 0 : i32
    %c0_i32_1 = arith.constant 0 : i32
    return %arg0, %c0_i32, %c0_i32_0 : i32, i32, i32
  }
  func.func @transform_2(%arg0: i32) -> (i32, i32, i32) {
    %c0_i32 = arith.constant 0 : i32
    %c0_i32_0 = arith.constant 0 : i32
    %c0_i32_1 = arith.constant 0 : i32
    return %arg0, %c0_i32, %c0_i32_0 : i32, i32, i32
  }
  func.func @transform_3(%arg0: i32) -> (i32, i32) {
    %c0_i32 = arith.constant 0 : i32
    %c0_i32_0 = arith.constant 0 : i32
    %c0_i32_1 = arith.constant 0 : i32
    return %c0_i32, %c0_i32_0 : i32, i32
  }
  func.func @transform_4(%arg0: i32) -> (i32, i32, i32) {
    %c0_i32 = arith.constant 0 : i32
    %c0_i32_0 = arith.constant 0 : i32
    %c0_i32_1 = arith.constant 0 : i32
    return %arg0, %c0_i32, %c0_i32_0 : i32, i32, i32
  }
  func.func @transform_5(%arg0: i32) -> (i32, i32, i32, i32) {
    %c0_i32 = arith.constant 0 : i32
    %c0_i32_0 = arith.constant 0 : i32
    %c0_i32_1 = arith.constant 0 : i32
    %c0_i32_2 = arith.constant 0 : i32
    return %c0_i32, %arg0, %c0_i32_0, %c0_i32_1 : i32, i32, i32, i32
  }
}

</mosaic_0001>

<bundles_post_ra>
// kernel: encode_compressor_pallas.1
= control target key start
LH: loop header
LB: loop body
LE: loop exit
PB: predicated region body
PF: predicated region fallthrough
CT: control target
= control target key end

     0   :  { %10 = vsyncpa [#allocation3], 0  ;;  %s1189_s0 = inlined_call_operand.vmem [shape: f32[4,50,30], index: 0, kind: input, shape index: {}]   ;;  %s1190_s1 = inlined_call_operand.vmem [shape: f32[4,32,50], index: 1, kind: input, shape index: {}]   ;;  %s1191_s2 = inlined_call_operand.vmem [shape: f32[4,32,30], index: 2, kind: input, shape index: {}]   ;;  %s1192_s3 = inlined_call_operand.vmem [shape: f32[30,256], index: 3, kind: input, shape index: {}]   ;;  %s1193_s4 = inlined_call_operand.vmem [shape: f32[4,136,128], index: 4, kind: input, shape index: {}]   ;;  %s1194_s5 = inlined_call_operand.hbm [shape: f32[2,4,16,128], index: 5, kind: output, shape index: {}]  }
   0x1   :  { %12 = vsyncpa [#allocation3 + $0x1], 0  ;;  %s1025_s18 = smov 0   ;;  %s1027_s19 = smov 0  }
   0x2   :  { %s1029_s20 = smov 0   ;;  %s1031_s21 = smov 0  }
   0x3 LB: > { %s1046_s22 = sadd.s32 4294967295, %s985_s21   ;;  %s775_s23 = sadd.s32 4294967294, %s985_s21   ;;  %s985_s21 = sphi %s1031_s21, %s1200_s21   ;;  %s981_s20 = sphi %s1029_s20, %s1199_s20   ;;  %s977_s19 = sphi %s1027_s19, %s1198_s19   ;;  %s973_s18 = sphi %s1025_s18, %s1197_s18  }
   0x4   : > { %s1050_s24 = sadd.s32 1, %s985_s21   ;;  %s150_s25 = sadd.s32 1, %s981_s20 }
   0x5   : > { %s147_s26 = ssub.s32 %s985_s21, %s1050_s24  ;;  %p160_p0 = scmp.ne.s32.totalorder %s981_s20, %s977_s19 }
   0x6   : > { %p148_p1 = scmp.eq.s32.totalorder %s147_s26, 0  ;;  %p161_p2 = scmp.eq.s32.totalorder %s1046_s22, 3 }
   0x7   : > { %p166_p3 = scmp.ne.s32.totalorder %s977_s19, %s973_s18  ;;  %p167_p4 = scmp.eq.s32.totalorder %s775_s23, 3 }
   0x8   : > { %s1061_s27 = scalar_select %p148_p1, %s981_s20, %s150_s25  }
   0x9   : > { %p1063_p5 = por %p161_p2, %p160_p0  ;;  %p1067_p6 = por %p167_p4, %p166_p3 }
   0xa   : > { %p778_p7 = scmp.ge.s32.totalorder %s985_s21, 1  ;;  %p220_p8 = scmp.lt.s32.totalorder %s985_s21, 5 }
   0xc   : > { %p221_p9 = pnand %p778_p7, %p220_p8 }
   0xd   : > { %p263_p10 = scmp.lt.s32.totalorder (!%p221_p9), %s1046_s22, 3 }
   0xe   : > { %224 = sbr.rel (%p221_p9) target bundleno = 654 (0x28e), region = 40 }
  0x13   : > { %s1075_s30 = scalar_select %p263_p10, %s1046_s22, 3  ;;  %vm294_vm0 = vcmask 408576   ;;  %vm307_vm1 = vcmask 1041408   ;;  %v415_v9 = vld [vmem:[%s1192_s3 + $0x38] sm:$0x3f]  ;;  %vm429_vm2 = vcmask 1045504  }
  0x14   : > { %v414_v11 = vld [vmem:[%s1192_s3 + $0x30] sm:$0x3f]  ;;  %v413_v13 = vld [vmem:[%s1192_s3 + $0x28] sm:$0xff]  ;;  %v412_v14 = vld [vmem:[%s1192_s3 + $0x20] sm:$0xff]  ;;  %v987_v19 = vmov 0.0   ;;  %vm416_vm3 = vcmask 244736  }
  0x15   : > { %s896_s6 = smul.u32 56, %s1075_s30  ;;  %s804_s7 = sshll.u32 %s1075_s30, 5  ;;  %v411_v15 = vld [vmem:[%s1192_s3 + $0x18] sm:$0xff]  ;;  %v410_v16 = vld [vmem:[%s1192_s3 + $0x10] sm:$0xff]  ;;  %v409_v17 = vld [vmem:[%s1192_s3 + $0x8] sm:$0xff] }
  0x16   : > { %s1084_s10 = scalar_lea.vmem %s1190_s1, %s804_s7  ;;  %v408_v18 = vld [vmem:[%s1192_s3] sm:$0xff]  ;;  %s897_s16 = smul.u32 136, %s1075_s30 }
  0x17   : > { %s267_s13 = scalar_lea.vmem %s1189_s0, %s896_s6  ;;  %v283_v0 = vld [vmem:[%s1084_s10] sm:$0xff]  ;;  %v284_v8 = vld [vmem:[%s1084_s10 + $0x8] sm:$0xff]  ;;  %v285_v10 = vld [vmem:[%s1084_s10 + $0x10] sm:$0xff]  ;;  %s277_s8 = scalar_lea.vmem %s1191_s2, %s804_s7 }
  0x18   : > { %v293_v1 = vld [vmem:[%s267_s13 + $0x30] sm:$0x3]  ;;  %v292_v2 = vld [vmem:[%s267_s13 + $0x28] sm:$0xff]  ;;  %852 = vmatprep.mubr.msk.f32.mxu0 %vm294_vm0, %v283_v0  ;;  %v291_v3 = vld [vmem:[%s267_s13 + $0x20] sm:$0xff]  ;;  %s1125_s25 = scalar_lea.vmem %s1193_s4, %s897_s16  ;;  %s260_s30 = sand.u32 1, %s977_s19   ;;  %v546_v0 = vlaneseq }
  0x19   : > { %838 = vmatprep.subr.msk.mxu0 %vm307_vm1, %v293_v1  ;;  %v290_v4 = vld [vmem:[%s267_s13 + $0x18] sm:$0xff]  ;;  %v289_v5 = vld [vmem:[%s267_s13 + $0x10] sm:$0xff]  ;;  %v288_v6 = vld [vmem:[%s267_s13 + $0x8] sm:$0xff]  ;;  %s779_s7 = sshll.u32 %s260_s30, 5 }
  0x1a   : > { %839 = vmatpush3.msk.msra.mxu0 %vm307_vm1, %v293_v1  ;;  %v287_v7 = vld [vmem:[%s267_s13] sm:$0xff]  ;;  %v286_v12 = vld [vmem:[%s1084_s10 + $0x18] sm:$0xff]  ;;  %v543_v21 = vld [vmem:[%s1125_s25 + $0x70] sm:$0xff]  ;;  %v547_v1 = vshrl.u32 %v546_v0, 7  ;;  %s262_s9 = scalar_lea.vmem [#allocation2], %s779_s7  ;;  %s641_s10 = scalar_lea.sflag [#allocation3], %s260_s30 }
  0x1b   : > { %840 = vmatprep.subr.mxu0 %v292_v2  ;;  %v544_v20 = vld [vmem:[%s1125_s25 + $0x78] sm:$0xff]  ;;  %v542_v22 = vld [vmem:[%s1125_s25 + $0x68] sm:$0xff]  ;;  %v541_v23 = vld [vmem:[%s1125_s25 + $0x60] sm:$0xff] }
  0x1c   : > { %841 = vmatpush3.msra.mxu0 %v292_v2  ;;  %858 = vmatprep.subr.mxu1 %v544_v20  ;;  %v540_v24 = vld [vmem:[%s1125_s25 + $0x58] sm:$0xff]  ;;  %v539_v25 = vld [vmem:[%s1125_s25 + $0x50] sm:$0xff]  ;;  %v538_v26 = vld [vmem:[%s1125_s25 + $0x48] sm:$0xff]  ;;  %v548_v2 = vsub.s32 0, %v547_v1 }
  0x1d   : > { %842 = vmatprep.subr.mxu0 %v291_v3  ;;  %859 = vmatpush3.msra.mxu1 %v544_v20  ;;  %v537_v27 = vld [vmem:[%s1125_s25 + $0x40] sm:$0xff]  ;;  %v536_v28 = vld [vmem:[%s1125_s25 + $0x38] sm:$0xff]  ;;  %v535_v29 = vld [vmem:[%s1125_s25 + $0x30] sm:$0xff] }
  0x1e   : > { %843 = vmatpush3.msra.mxu0 %v291_v3  ;;  %860 = vmatprep.subr.mxu1 %v543_v21  ;;  %v534_v30 = vld [vmem:[%s1125_s25 + $0x28] sm:$0xff]  ;;  %v533_v31 = vld [vmem:[%s1125_s25 + $0x20] sm:$0xff]  ;;  %v402_v43 = vld [vmem:[%s277_s8 + $0x10] sm:$0xff] }
  0x1f   : > { %844 = vmatprep.subr.mxu0 %v290_v4  ;;  %861 = vmatpush3.msra.mxu1 %v543_v21  ;;  %v400_v34 = vld [vmem:[%s277_s8] sm:$0xff]  ;;  %v401_v39 = vld [vmem:[%s277_s8 + $0x8] sm:$0xff]  ;;  %v403_v46 = vld [vmem:[%s277_s8 + $0x18] sm:$0xff] }
  0x20   : > { %845 = vmatpush3.msra.mxu0 %v290_v4  ;;  %862 = vmatprep.subr.mxu1 %v542_v22  ;;  %v532_v48 = vld [vmem:[%s1125_s25 + $0x18] sm:$0xff]  ;;  %v531_v49 = vld [vmem:[%s1125_s25 + $0x10] sm:$0xff]  ;;  %v530_v50 = vld [vmem:[%s1125_s25 + $0x8] sm:$0xff] }
  0x21   : > { %846 = vmatprep.subr.mxu0 %v289_v5  ;;  %863 = vmatpush3.msra.mxu1 %v542_v22  ;;  %v529_v51 = vld [vmem:[%s1125_s25] sm:$0xff] }
  0x22   : > { %847 = vmatpush3.msra.mxu0 %v289_v5  ;;  %864 = vmatprep.subr.mxu1 %v541_v23  ;;  %v545_v3 = vld [vmem:[%s1125_s25 + $0x80] sm:$0xff] }
  0x23   : > { %848 = vmatprep.subr.mxu0 %v288_v6  ;;  %865 = vmatpush3.msra.mxu1 %v541_v23  ;;  %v549_v4 = vrot.slane %v545_v3, %v548_v2 }
  0x24   : > { %849 = vmatpush3.msra.mxu0 %v288_v6  ;;  %866 = vmatprep.subr.mxu1 %v540_v24 }
  0x25   : > { %850 = vmatprep.subr.mxu0 %v287_v7  ;;  %867 = vmatpush3.msra.mxu1 %v540_v24 }
  0x26   : > { %851 = vmatpush3.msra.mxu0 %v287_v7  ;;  %868 = vmatprep.subr.mxu1 %v539_v25 }
  0x27   : > { %853 = vmatmul.mubr.msk.f32.vlgmr.msra.gmra.mxu0 %vm294_vm0, %v284_v8  ;;  %791 = vmatprep.subr.msk.mxu0 %vm429_vm2, %v415_v9 }
  0x28   : > { %855 = vmatprep.mubr.msk.f32.mxu0 %vm294_vm0, %v285_v10  ;;  %792 = vmatpush1.msk.msra.mxu0 %vm429_vm2, %v414_v11 }
  0x29   : > { %462 = vmatprep.subr.mxu0 %v413_v13  ;;  %869 = vmatpush3.msra.mxu1 %v539_v25 }
  0x2a   : > { %463 = vmatpush1.msra.mxu0 %v412_v14  ;;  %870 = vmatprep.subr.mxu1 %v538_v26 }
  0x2b   : > { %856 = vmatmul.mubr.msk.f32.gmra.mxu0 %vm294_vm0, %v286_v12  ;;  %464 = vmatprep.subr.mxu0 %v411_v15 }
  0x2c   : > { %465 = vmatpush1.msra.mxu0 %v410_v16  ;;  %500 = vmatprep.mubr.f32.mxu0 %v987_v19 }
  0x2d   : > { %466 = vmatprep.subr.mxu0 %v409_v17  ;;  %871 = vmatpush3.msra.mxu1 %v538_v26 }
  0x2e   : > { %467 = vmatpush1.msra.mxu0 %v408_v18  ;;  %872 = vmatprep.subr.mxu1 %v537_v27 }
  0x2f   : > { %873 = vmatpush3.msra.mxu1 %v537_v27 }
  0x30   : > { %874 = vmatprep.subr.mxu1 %v536_v28 }
  0x31   : > { %875 = vmatpush3.msra.mxu1 %v536_v28 }
  0x32   : > { %876 = vmatprep.subr.mxu1 %v535_v29 }
  0x33   : > { %877 = vmatpush3.msra.mxu1 %v535_v29 }
  0x34   : > { %878 = vmatprep.subr.mxu1 %v534_v30 }
  0x35   : > { %879 = vmatpush3.msra.mxu1 %v534_v30 }
  0x36   : > { %880 = vmatprep.subr.mxu1 %v533_v31 }
  0x37   : > { %881 = vmatpush3.msra.mxu1 %v533_v31 }
  0x38   : > { %882 = vmatprep.subr.mxu1 %v532_v48 }
  0x39   : > { %883 = vmatpush3.msra.mxu1 %v532_v48 }
  0x3a   : > { %884 = vmatprep.subr.mxu1 %v531_v49 }
  0x3b   : > { %885 = vmatpush3.msra.mxu1 %v531_v49 }
  0x3c   : > { %886 = vmatprep.subr.mxu1 %v530_v50 }
  0x3d   : > { %887 = vmatpush3.msra.mxu1 %v530_v50 }
  0x3e   : > { %888 = vmatprep.subr.mxu1 %v529_v51 }
  0x3f   : > { %889 = vmatpush3.msra.mxu1 %v529_v51 }
  0xe7   : > { %v854_v32 = vpop.f32.mrf.mxu0 }
  0xe8   : > { %v397_v37 = vmax.f32 %v854_v32, 0.0 }
  0xe9   : > { %v377_v33 = vpop.f32.mrf.mxu0 }
  0xea   : > { %v396_v35 = vmax.f32 %v377_v33, 0.0  ;;  %v405_v41 = vadd.f32 %v401_v39, %v397_v37 }
  0xeb   : > { %v857_v36 = vpop.f32.mrf.mxu0 }
  0xec   : > { %v404_v38 = vadd.f32 %v400_v34, %v396_v35  ;;  %v399_v44 = vmax.f32 %v857_v36, 0.0 }
  0xed   : > { %v387_v40 = vpop.f32.mrf.mxu0 }
  0xee   : > { %793 = vmatmul.mubr.msk.f32.vlgmr.msra.gmra.mxu0 %vm416_vm3, %v404_v38  ;;  %v398_v42 = vmax.f32 %v387_v40, 0.0  ;;  %v407_v47 = vadd.f32 %v403_v46, %v399_v44 }
  0xef   : > { %506 = vmatprep.mubr.f32.mxu0 %v987_v19 }
  0xf0   : > { %v406_v45 = vadd.f32 %v402_v43, %v398_v42 }
  0xf2   : > { %794 = vmatmul.mubr.msk.f32.gmra.mxu0 %vm416_vm3, %v405_v41 }
  0xf3   : > { %512 = vmatprep.mubr.f32.mxu0 %v987_v19 }
  0xf6   : > { %795 = vmatmul.mubr.msk.f32.gmra.mxu0 %vm416_vm3, %v406_v45 }
  0xf7   : > { %518 = vmatprep.mubr.f32.mxu0 %v987_v19 }
  0xfa   : > { %796 = vmatmul.mubr.msk.f32.gmra.mxu0 %vm416_vm3, %v407_v47 }
 0x1ae   : > { %v502_v52 = vpop.f32.mrf.mxu0 }
 0x1b0   : > { %v504_v53 = vpop.f32.mrf.mxu0 }
 0x1b1   : > { %v525_v54 = vmax.f32 %v502_v52, %v504_v53 }
 0x1b2   : > { %v508_v55 = vpop.f32.mrf.mxu0 }
 0x1b3   : > { %890 = vmatprep.mubr.f32.mxu1 %v525_v54 }
 0x1b4   : > { %v510_v56 = vpop.f32.mrf.mxu0 }
 0x1b5   : > { %v526_v57 = vmax.f32 %v508_v55, %v510_v56 }
 0x1b6   : > { %v514_v58 = vpop.f32.mrf.mxu0 }
 0x1b7   : > { %891 = vmatmul.mubr.f32.vlgmr.msra.gmra.mxu1 %v526_v57 }
 0x1b8   : > { %v516_v59 = vpop.f32.mrf.mxu0 }
 0x1b9   : > { %v527_v60 = vmax.f32 %v514_v58, %v516_v59 }
 0x1ba   : > { %v520_v61 = vpop.f32.mrf.mxu0 }
 0x1bb   : > { %893 = vmatprep.mubr.f32.mxu1 %v527_v60 }
 0x1bc   : > { %v522_v62 = vpop.f32.mrf.mxu0 }
 0x1bd   : > { %v528_v63 = vmax.f32 %v520_v61, %v522_v62 }
 0x1bf   : > { %894 = vmatmul.mubr.f32.gmra.mxu1 %v528_v63 }
 0x277   : > { %v892_v5 = vpop.f32.mrf.mxu1 }
 0x278   : > { %v622_v6 = vadd.f32 %v892_v5, %v549_v4 }
 0x279   : > { %v616_v7 = vpop.f32.mrf.mxu1 }
 0x27a   : > { %636 = vst [vmem:[%s262_s9 + $0x8] sm:$0xff] %v622_v6  ;;  %v617_v8 = vadd.f32 %v616_v7, %v549_v4 }
 0x27c   : > { %635 = vst [vmem:[%s262_s9] sm:$0xff] %v617_v8 }
 0x27f   : > { %v895_v9 = vpop.f32.mrf.mxu1 }
 0x280   : > { %v632_v10 = vadd.f32 %v895_v9, %v549_v4 }
 0x281   : > { %v626_v11 = vpop.f32.mrf.mxu1 }
 0x282   : > { %798 = vst [vmem:[%s262_s9 + $0x18] sm:$0xff] %v632_v10  ;;  %v627_v12 = vadd.f32 %v626_v11, %v549_v4 }
 0x284   : > { %797 = vst [vmem:[%s262_s9 + $0x10] sm:$0xff] %v627_v12 }
 0x285   : > { %s806_s11 = sshll.u32 %s1046_s22, 8  ;;  %s664_s12 = sshll.u32 %s262_s9, 4  ;;  %s665_s12 = int_to_ptr.vmem [resolvable:$true] %s664_s12 }
 0x286   : > { %s653_s15 = scalar_lea.hbm %s1194_s5, %s806_s11  ;;  %s988_s16 = smov 256  }
 0x287   : > { %898 = sst [smem:[#allocation5]] (%p1063_p5), %s988_s16  ;;  %s989_s17 = smov 1024  }
 0x288   : > { %899 = sst [smem:[#allocation5 + $0x1]] (%p1063_p5), %s989_s17  ;;  %s990_s23 = smov 2  }
 0x289   : > { %900 = sst [smem:[#allocation5 + $0x2]] (%p1063_p5), %s990_s23  ;;  %s991_s25 = smov 128  }
 0x28a   : > { %901 = sst [smem:[#allocation5 + $0x3]] (%p1063_p5), %s991_s25  ;;  %s992_s22 = smov 8  }
 0x28b   : > { %902 = sst [smem:[#allocation5 + $0x4]] (%p1063_p5), %s991_s25  ;;  %s993_s26 = smov 131072  }
 0x28c   : > { %903 = sst [smem:[#allocation5 + $0x5]] (%p1063_p5), %s992_s22  ;;  %s994_s6 = smov 0  }
 0x28d   : > { %904 = dma.general (%p1063_p5), %s665_s12, 512, %s653_s15, %s641_s10, %s993_s26, [#allocation5], %s994_s6, 0  }
 0x28e PF: > { %p910_p11 = scmp.ge.s32.totalorder %s985_s21, 2  ;;  %s692_s8 = sand.u32 1, %s973_s18  }
 0x28f   : > { %s693_s30 = scalar_lea.sflag [#allocation3], %s692_s8 }
 0x290   : > { %p907_p12 = pnand %p910_p11, %p1067_p6 }
 0x292   : > { %p908_p13 = pneg %p907_p12 }
 0x294   : > { %968 = dma.done.wait (%p908_p13), %s693_s30, 512  }
 0x295   : > { %970 = vsyncadd (%p908_p13), %s693_s30, 4294966784  ;;  %p15_p0 = scmp.ge.s32.totalorder %s1050_s24, 6   ;;  %s1197_s18 = smov %s977_s19 }
 0x296   : > { %s1198_s19 = smov %s981_s20  ;;  %s1199_s20 = smov %s1061_s27 }
 0x297   : > { %s1200_s21 = smov %s1050_s24  ;;  %17 = sbr.rel (!%p15_p0) target bundleno = 3 (0x3), region = 90 }
 0x29c   :  { %698 = vsyncpa [#allocation3], 1 }
 0x29d   :  { %700 = vsyncpa [#allocation3 + $0x1], 1 }

</bundles_post_ra>
